<compile_context>
chip_gen: v7x
topology: tpu7x:2x2x1
jax: 0.10.0
libtpu: 0.0.40
codegen_flags: <defaults>
</compile_context>

<pallas_src>
import functools

import numpy as np
import jax
import jax.numpy as jnp
from jax.experimental import pallas as pl
from jax.experimental.pallas import tpu as pltpu


# ------------------------------ Pallas kernel ------------------------------ #

def _attention_kernel(x_ref, w1_ref, b1_ref, w2_ref, b2_ref, seg_ref, tb_ref,
                      o_ref, acc_ref, *, inv_spatial, temp_value, tile_l,
                      total_l, mask_tail):
    """Fused avgpool -> (fc1 + folded BN) -> ReLU -> fc2 -> per-mixture L1
    normalisation -> temperature blend.

    Grid = (batch_blocks, spatial_tiles); the spatial axis accumulates into
    acc_ref (re-initialised at l == 0 for every batch block).
      x_ref  : (TB, C, TL)  channels-first spatial tile (TL on the lane axis)
      w1_ref : (C, Hd)      fc1 weight with BN scale folded in
      b1_ref : (1, Hd)      folded BN shift
      w2_ref : (Hd, KW)     fc2 weight
      b2_ref : (1, KW)      fc2 bias
      seg_ref: (KW, KW)     0/1 block-diagonal "same mixture" matrix
      tb_ref : (1, KW)      temp_bias
      o_ref  : (TB, 1, KW)  lane-dense output rows for this batch block
      acc_ref: (TB, C, 128) VMEM scratch: 128-lane partial spatial sums
    """
    l = pl.program_id(1)

    @pl.when(l == 0)
    def _init():
        acc_ref[...] = jnp.zeros_like(acc_ref)

    tb, c, _ = x_ref.shape
    n_full, rem = divmod(tile_l, 128)
    n_slabs = n_full + (1 if rem else 0)

    if mask_tail:
        # Hoisted lane-position iota (JAX does not CSE broadcast_in_dim).
        lane_ids = jax.lax.broadcasted_iota(jnp.int32, (tb, c, 128), 2)
        tile_base = l * tile_l

    # Streaming spatial accumulation in 128-lane slabs: lane-aligned VMEM
    # loads + VPU adds only; no relayout while streaming.
    for i in range(n_slabs):
        start = i * 128
        w = 128 if i < n_full else rem
        slab = x_ref[:, :, start:start + w].astype(jnp.float32)
        if mask_tail:
            # Zero lanes past the true spatial extent (ragged last grid tile).
            valid = total_l - tile_base - start
            slab = jnp.where(lane_ids[:, :, :w] < valid, slab, 0.0)
        if w == 128:
            acc_ref[...] += slab
        else:
            acc_ref[:, :, :w] += slab

    @pl.when(l == pl.num_programs(1) - 1)
    def _finalize():
        # One cross-lane reduce + tiny relayout per batch block (noise).
        pooled = jnp.sum(acc_ref[...], axis=-1) * inv_spatial          # (TB, C)

        # fc1 with inference-mode BatchNorm folded into (w1, b1), then ReLU.
        h = jnp.dot(pooled, w1_ref[...],
                    preferred_element_type=jnp.float32) + b1_ref[...]  # (TB, Hd)
        h = jnp.maximum(h, 0.0)

        # fc2 (+ bias).
        y = jnp.dot(h, w2_ref[...],
                    preferred_element_type=jnp.float32) + b2_ref[...]  # (TB, KW)

        # Per-mixture L1 normalisation.  seg is a constant 0/1 block-diagonal
        # matrix so denom[j] = sum_{i in mixture(j)} |y[i]|; the small matmul
        # avoids an in-kernel (TB, KW) -> (TB*M, P) relayout, and HIGHEST keeps
        # the denominator f32-exact at negligible cost (finalize only).
        denom = jnp.dot(jnp.abs(y), seg_ref[...],
                        preferred_element_type=jnp.float32,
                        precision=jax.lax.Precision.HIGHEST) + 0.001
        y = y / denom

        # Temperature blend (temp_value is a static module attribute).
        y = (1.0 - temp_value) * y + temp_value * tb_ref[...]

        o_ref[...] = y.reshape(o_ref.shape).astype(o_ref.dtype)


# ------------------------------ JAX wrapper -------------------------------- #

def attention_forward(x, w1, bn_gamma, bn_beta, bn_mean, bn_var, bn_eps,
                      w2, b2, temp_bias, temp_value, *,
                      num_local_mixture, kw_planes_per_mixture,
                      spatial_tile=8192, batch_tile=None):
    """Attention.forward with nonlocal_basis_ratio=1.0 (map_to_cell=Identity).

    Weight layout is (in, out), i.e. the transpose of torch.nn.Linear.weight.
    BatchNorm1d is applied in inference mode (running stats) and folded into
    fc1 at trace time.
    """
    B, C = int(x.shape[0]), int(x.shape[1])
    L = int(np.prod(x.shape[2:]))
    Hd = int(w1.shape[1])
    M = int(num_local_mixture)
    P = int(kw_planes_per_mixture)
    KW = M * P
    assert w2.shape == (Hd, KW) and b2.shape == (KW,) and temp_bias.shape == (KW,)

    # Batch blocking: amortise per-step overhead but keep >= 2 blocks on the
    # "parallel" batch axis so both v7x TensorCores get work (v5e/v6e: 1 TC).
    if batch_tile is None:
        TB = 1
        for t in range(2, min(8, B) + 1):
            if B % t == 0 and (B // t) >= 2:
                TB = t
    else:
        TB = int(batch_tile)
    assert B % TB == 0, "batch must be divisible by the batch tile"

    # Spatial tile: as large as a ~2 MiB/buffer budget allows (multiple of 128
    # lanes, or the full L).  2x-buffered x (~4 MiB) + resident weights stay
    # well inside the 16 MiB (v5e) / 32 MiB (v6e, v7x) default scoped VMEM.
    buf_budget = 2 << 20
    budget_tl = max(128, (buf_budget // (TB * C * 4)) // 128 * 128)
    TL = min(int(spatial_tile), budget_tl)
    TL = max(128, TL // 128 * 128)
    if L <= TL:
        TL = L                      # single tile covering the full extent
    n_l = (L + TL - 1) // TL
    mask_tail = (L % TL) != 0       # ragged last tile -> in-kernel lane mask

    # Fold inference-mode BatchNorm1d into fc1 (algebraically identical):
    #   BN(p @ w1) = p @ (w1 * s) + (beta - mean * s),  s = gamma / sqrt(var+eps)
    scale = bn_gamma * jax.lax.rsqrt(bn_var + bn_eps)
    w1f = (w1 * scale[None, :]).astype(jnp.float32)                    # (C, Hd)
    b1f = (bn_beta - bn_mean * scale).reshape(1, Hd).astype(jnp.float32)

    # x stays channels-first: no HBM transpose, only a free 3-D reshape.
    x3 = x.reshape(B, C, L)

    # Constant 0/1 block-diagonal "same mixture" matrix (KW, KW).
    seg = jnp.asarray(np.kron(np.eye(M, dtype=np.float32),
                              np.ones((P, P), dtype=np.float32)))

    b2r = b2.reshape(1, KW).astype(jnp.float32)
    tbr = temp_bias.reshape(1, KW).astype(jnp.float32)

    kern = functools.partial(_attention_kernel,
                             inv_spatial=1.0 / float(L),
                             temp_value=float(temp_value),
                             tile_l=TL, total_l=L, mask_tail=mask_tail)

    weight_bytes = 4 * (C * Hd + Hd + Hd * KW + KW + KW * KW + KW)
    cost = pl.CostEstimate(
        flops=int(2 * B * C * L) + int(2 * B * (C * Hd + Hd * KW + KW * KW)),
        transcendentals=0,
        bytes_accessed=int(4 * B * C * L) + 2 * weight_bytes + int(4 * B * KW))

    out = pl.pallas_call(
        kern,
        out_shape=jax.ShapeDtypeStruct((B, 1, KW), jnp.float32),
        grid=(B // TB, n_l),
        in_specs=[
            pl.BlockSpec((TB, C, TL), lambda b, l: (b, 0, l)),   # x tile
            pl.BlockSpec((C, Hd), lambda b, l: (0, 0)),          # fc1 (BN folded)
            pl.BlockSpec((1, Hd), lambda b, l: (0, 0)),          # folded shift
            pl.BlockSpec((Hd, KW), lambda b, l: (0, 0)),         # fc2 weight
            pl.BlockSpec((1, KW), lambda b, l: (0, 0)),          # fc2 bias
            pl.BlockSpec((KW, KW), lambda b, l: (0, 0)),         # segment matrix
            pl.BlockSpec((1, KW), lambda b, l: (0, 0)),          # temp_bias
        ],
        out_specs=pl.BlockSpec((TB, 1, KW), lambda b, l: (b, 0, 0)),
        scratch_shapes=[pltpu.VMEM((TB, C, 128), jnp.float32)],
        compiler_params=pltpu.CompilerParams(
            dimension_semantics=("parallel", "arbitrary")),
        cost_estimate=cost,
    )(x3, w1f, b1f, w2, b2r, seg, tbr)

    # Final reshape + drop the trailing "zero cell" of every mixture.
    return out.reshape(B * M, P)[:, :-1]


# --------------------------- pure-JAX reference ----------------------------- #

def reference_forward(x, w1, bn_gamma, bn_beta, bn_mean, bn_var, bn_eps,
                      w2, b2, temp_bias, temp_value, *,
                      num_local_mixture, kw_planes_per_mixture):
    """Faithful (unfolded) re-implementation of Attention.forward in f32."""
    B, C = x.shape[0], x.shape[1]
    M = num_local_mixture
    P = kw_planes_per_mixture
    hp = jax.lax.Precision.HIGHEST
    pooled = jnp.mean(x.reshape(B, C, -1), axis=-1)                    # avgpool
    h = jnp.dot(pooled, w1, precision=hp)                              # fc1 (no bias)
    h = (h - bn_mean) * jax.lax.rsqrt(bn_var + bn_eps) * bn_gamma + bn_beta
    h = jnp.maximum(h, 0.0)                                            # ReLU
    y = jnp.dot(h, w2, precision=hp) + b2                              # fc2
    y = y.reshape(-1, P)
    y = y / (jnp.sum(jnp.abs(y), axis=1, keepdims=True) + 0.001)
    y = (1.0 - temp_value) * y.reshape(B, M * P) + temp_value * temp_bias.reshape(1, -1)
    return y.reshape(-1, P)[:, :-1]


# --------------------------------- main ------------------------------------ #

def _make_params(key, in_planes, hidden, KW, M, P):
    ks = jax.random.split(key, 7)
    # fc1: Linear(in_planes, hidden, bias=False) — kaiming_normal(fan_out, relu)
    w1 = jax.random.normal(ks[0], (in_planes, hidden), jnp.float32) * np.sqrt(2.0 / hidden)
    # BatchNorm1d(hidden): inference-mode statistics (stand-in for learned state).
    bn_gamma = 1.0 + 0.1 * jax.random.normal(ks[1], (hidden,), jnp.float32)
    bn_beta = 0.1 * jax.random.normal(ks[2], (hidden,), jnp.float32)
    bn_mean = 0.1 * jax.random.normal(ks[3], (hidden,), jnp.float32)
    bn_var = 0.8 + 0.2 * jnp.abs(jax.random.normal(ks[4], (hidden,), jnp.float32))
    # fc2: Linear(hidden, KW, bias=True) — nonzero bias to exercise the path.
    w2 = jax.random.normal(ks[5], (hidden, KW), jnp.float32) * np.sqrt(2.0 / KW)
    b2 = 0.05 * jax.random.normal(ks[6], (KW,), jnp.float32)
    # temp_bias: 0/1 pattern like init_temperature(num_cell_per_mixture=1).
    tb_np = np.zeros((KW,), dtype=np.float32)
    for m in range(M):
        tb_np[m * P + (m % (P - 1))] = 1.0
    return w1, bn_gamma, bn_beta, bn_mean, bn_var, w2, b2, jnp.asarray(tb_np)


def _run_case(key, B, in_planes, spatial, reduction, num_static_cell, M,
              temp_value, spatial_tile=8192):
    hidden = max(int(in_planes * reduction), 16)
    P = num_static_cell + 1
    KW = P * M
    bn_eps = 1e-5
    kx, kp = jax.random.split(key)
    x = jax.random.normal(kx, (B, in_planes) + spatial, dtype=jnp.float32)
    (w1, g, b, mu, var, w2, b2, tbias) = _make_params(kp, in_planes, hidden, KW, M, P)

    out = attention_forward(x, w1, g, b, mu, var, bn_eps, w2, b2, tbias,
                            temp_value, num_local_mixture=M,
                            kw_planes_per_mixture=P, spatial_tile=spatial_tile)
    out = jax.block_until_ready(out)

    ref = reference_forward(x, w1, g, b, mu, var, bn_eps, w2, b2, tbias,
                            temp_value, num_local_mixture=M,
                            kw_planes_per_mixture=P)

    assert out.shape == (B * M, num_static_cell), out.shape
    assert bool(jnp.all(jnp.isfinite(out)))
    # Kernel fc matmuls run at default MXU precision (bf16 inputs, f32 acc) per
    # the perf guidance; the reference is ~exact f32, so tolerance is sized for
    # that (observed error is well below this bound).
    max_err = float(jnp.max(jnp.abs(out - ref)))
    assert bool(jnp.allclose(out, ref, atol=1e-2, rtol=2e-2)), max_err


if __name__ == "__main__":
    # TODO(synk): training-mode BatchNorm1d (batch statistics) and the
    # map_to_cell_basis branch (nonlocal_basis_ratio < 1.0) are not implemented;
    # the module defaults (eval-style running stats, map_to_cell = Identity) are.
    key = jax.random.PRNGKey(0)
    k1, k2 = jax.random.split(key)

    # Attention(in_planes=64, reduction=0.5, num_static_cell=15, num_local_mixture=8),
    # temp_value=0.25 as set by update_temperature; L=256 -> single spatial tile.
    _run_case(k1, B=2, in_planes=64, spatial=(16, 16), reduction=0.5,
              num_static_cell=15, M=8, temp_value=0.25)

    # Ragged, multi-tile spatial path (L=320 streamed as three 128-wide tiles):
    # exercises the accumulator across grid steps and the in-kernel lane mask.
    _run_case(k2, B=2, in_planes=32, spatial=(10, 32), reduction=0.5,
              num_static_cell=15, M=8, temp_value=0.25, spatial_tile=128)

    print("KERNEL_OK")
</pallas_src>

<mosaic_0001>
module attributes {stable_mosaic.version = 11 : i64} {
  func.func @_attention_kernel(%arg0: i32, %arg1: i32, %arg2: memref<1x64x256xf32, #tpu.memory_space<vmem>>, %arg3: memref<64x32xf32, #tpu.memory_space<vmem>>, %arg4: memref<1x32xf32, #tpu.memory_space<vmem>>, %arg5: memref<32x128xf32, #tpu.memory_space<vmem>>, %arg6: memref<1x128xf32, #tpu.memory_space<vmem>>, %arg7: memref<128x128xf32, #tpu.memory_space<vmem>>, %arg8: memref<1x128xf32, #tpu.memory_space<vmem>>, %arg9: memref<1x1x128xf32, #tpu.memory_space<vmem>>, %arg10: memref<1x64x128xf32, #tpu.memory_space<vmem>>) attributes {dimension_semantics = [#tpu.dimension_semantics<parallel>, #tpu.dimension_semantics<arbitrary>], iteration_bounds = array<i64: 2, 1>, scalar_prefetch = 0 : i64, scratch_operands = 1 : i64, tpu.core_type = #tpu.core_type<tc>, window_params = [{transform_indices = @transform_0, window_bounds = array<i64: 1, 64, 256>}, {pipeline_mode = #tpu.pipeline_mode<synchronous>, transform_indices = @transform_1, window_bounds = array<i64: 64, 32>}, {pipeline_mode = #tpu.pipeline_mode<synchronous>, transform_indices = @transform_2, window_bounds = array<i64: 1, 32>}, {pipeline_mode = #tpu.pipeline_mode<synchronous>, transform_indices = @transform_3, window_bounds = array<i64: 32, 128>}, {pipeline_mode = #tpu.pipeline_mode<synchronous>, transform_indices = @transform_4, window_bounds = array<i64: 1, 128>}, {pipeline_mode = #tpu.pipeline_mode<synchronous>, transform_indices = @transform_5, window_bounds = array<i64: 128, 128>}, {pipeline_mode = #tpu.pipeline_mode<synchronous>, transform_indices = @transform_6, window_bounds = array<i64: 1, 128>}, {transform_indices = @transform_7, window_bounds = array<i64: 1, 1, 128>}]} {
    %c0_i32 = arith.constant 0 : i32
    %0 = arith.cmpi eq, %arg1, %c0_i32 : i32
    %1 = arith.extui %0 : i1 to i32
    %c0_i32_0 = arith.constant 0 : i32
    %2 = arith.cmpi ne, %1, %c0_i32_0 : i32
    scf.if %2 {
      %cst = arith.constant 0.000000e+00 : f32
      %14 = vector.broadcast %cst : f32 to vector<1x64x128xf32>
      %c0_19 = arith.constant 0 : index
      %c0_20 = arith.constant 0 : index
      %c0_21 = arith.constant 0 : index
      %15 = vector.load %arg10[%c0_19, %c0_20, %c0_21] : memref<1x64x128xf32, #tpu.memory_space<vmem>>, vector<1x64x128xf32>
      tpu.vector_store %arg10[%c0_19, %c0_20, %c0_21], %14 {strides = array<i32>} : memref<1x64x128xf32, #tpu.memory_space<vmem>>, vector<1x64x128xf32>,
    } else {
    }
    %c0 = arith.constant 0 : index
    %c0_1 = arith.constant 0 : index
    %c0_2 = arith.constant 0 : index
    %3 = vector.load %arg2[%c0, %c0_1, %c0_2] : memref<1x64x256xf32, #tpu.memory_space<vmem>>, vector<1x64x128xf32>
    %c0_3 = arith.constant 0 : index
    %c0_4 = arith.constant 0 : index
    %c0_5 = arith.constant 0 : index
    %4 = vector.load %arg10[%c0_3, %c0_4, %c0_5] : memref<1x64x128xf32, #tpu.memory_space<vmem>>, vector<1x64x128xf32>
    %5 = arith.addf %4, %3 : vector<1x64x128xf32>
    %c0_6 = arith.constant 0 : index
    %c0_7 = arith.constant 0 : index
    %c0_8 = arith.constant 0 : index
    %6 = vector.load %arg10[%c0_6, %c0_7, %c0_8] : memref<1x64x128xf32, #tpu.memory_space<vmem>>, vector<1x64x128xf32>
    tpu.vector_store %arg10[%c0_6, %c0_7, %c0_8], %5 {strides = array<i32>} : memref<1x64x128xf32, #tpu.memory_space<vmem>>, vector<1x64x128xf32>,
    %c0_9 = arith.constant 0 : index
    %c0_10 = arith.constant 0 : index
    %c128 = arith.constant 128 : index
    %7 = vector.load %arg2[%c0_9, %c0_10, %c128] : memref<1x64x256xf32, #tpu.memory_space<vmem>>, vector<1x64x128xf32>
    %c0_11 = arith.constant 0 : index
    %c0_12 = arith.constant 0 : index
    %c0_13 = arith.constant 0 : index
    %8 = vector.load %arg10[%c0_11, %c0_12, %c0_13] : memref<1x64x128xf32, #tpu.memory_space<vmem>>, vector<1x64x128xf32>
    %9 = arith.addf %8, %7 : vector<1x64x128xf32>
    %c0_14 = arith.constant 0 : index
    %c0_15 = arith.constant 0 : index
    %c0_16 = arith.constant 0 : index
    %10 = vector.load %arg10[%c0_14, %c0_15, %c0_16] : memref<1x64x128xf32, #tpu.memory_space<vmem>>, vector<1x64x128xf32>
    tpu.vector_store %arg10[%c0_14, %c0_15, %c0_16], %9 {strides = array<i32>} : memref<1x64x128xf32, #tpu.memory_space<vmem>>, vector<1x64x128xf32>,
    %c0_i32_17 = arith.constant 0 : i32
    %11 = arith.cmpi eq, %arg1, %c0_i32_17 : i32
    %12 = arith.extui %11 : i1 to i32
    %c0_i32_18 = arith.constant 0 : i32
    %13 = arith.cmpi ne, %12, %c0_i32_18 : i32
    scf.if %13 {
      %c0_19 = arith.constant 0 : index
      %c0_20 = arith.constant 0 : index
      %c0_21 = arith.constant 0 : index
      %14 = vector.load %arg10[%c0_19, %c0_20, %c0_21] : memref<1x64x128xf32, #tpu.memory_space<vmem>>, vector<1x64x128xf32>
      %cst = arith.constant dense<0.000000e+00> : vector<1x64xf32>
      %15 = vector.multi_reduction <add>, %14, %cst [2] : vector<1x64x128xf32> to vector<1x64xf32>
      %cst_22 = arith.constant 3.906250e-03 : f32
      %16 = vector.broadcast %cst_22 : f32 to vector<1x64xf32>
      %17 = arith.mulf %15, %16 : vector<1x64xf32>
      %c0_23 = arith.constant 0 : index
      %c0_24 = arith.constant 0 : index
      %18 = vector.load %arg3[%c0_23, %c0_24] : memref<64x32xf32, #tpu.memory_space<vmem>>, vector<64x32xf32>
      %cst_25 = arith.constant dense<0.000000e+00> : vector<1x32xf32>
      %19 = tpu.matmul %17, %18, %cst_25 {dimension_numbers = #tpu.dot_dimension_numbers<[1], [0], [0], [1], [0, 0, 1, 1], [], []>} : vector<1x64xf32>, vector<64x32xf32>, vector<1x32xf32> -> vector<1x32xf32>
      %c0_26 = arith.constant 0 : index
      %c0_27 = arith.constant 0 : index
      %20 = vector.load %arg4[%c0_26, %c0_27] : memref<1x32xf32, #tpu.memory_space<vmem>>, vector<1x32xf32>
      %21 = arith.addf %19, %20 : vector<1x32xf32>
      %cst_28 = arith.constant 0.000000e+00 : f32
      %22 = vector.broadcast %cst_28 : f32 to vector<1x32xf32>
      %23 = arith.maximumf %21, %22 : vector<1x32xf32>
      %c0_29 = arith.constant 0 : index
      %c0_30 = arith.constant 0 : index
      %24 = vector.load %arg5[%c0_29, %c0_30] : memref<32x128xf32, #tpu.memory_space<vmem>>, vector<32x128xf32>
      %cst_31 = arith.constant dense<0.000000e+00> : vector<1x128xf32>
      %25 = tpu.matmul %23, %24, %cst_31 {dimension_numbers = #tpu.dot_dimension_numbers<[1], [0], [0], [1], [0, 0, 1, 1], [], []>} : vector<1x32xf32>, vector<32x128xf32>, vector<1x128xf32> -> vector<1x128xf32>
      %c0_32 = arith.constant 0 : index
      %c0_33 = arith.constant 0 : index
      %26 = vector.load %arg6[%c0_32, %c0_33] : memref<1x128xf32, #tpu.memory_space<vmem>>, vector<1x128xf32>
      %27 = arith.addf %25, %26 : vector<1x128xf32>
      %28 = math.absf %27 : vector<1x128xf32>
      %c0_34 = arith.constant 0 : index
      %c0_35 = arith.constant 0 : index
      %29 = vector.load %arg7[%c0_34, %c0_35] : memref<128x128xf32, #tpu.memory_space<vmem>>, vector<128x128xf32>
      %cst_36 = arith.constant dense<0.000000e+00> : vector<1x128xf32>
      %30 = tpu.matmul %28, %29, %cst_36 {dimension_numbers = #tpu.dot_dimension_numbers<[1], [0], [0], [1], [0, 0, 1, 1], [], []>, precision = #tpu.contract_precision<fp32>} : vector<1x128xf32>, vector<128x128xf32>, vector<1x128xf32> -> vector<1x128xf32>
      %cst_37 = arith.constant 1.000000e-03 : f32
      %31 = vector.broadcast %cst_37 : f32 to vector<1x128xf32>
      %32 = arith.addf %30, %31 : vector<1x128xf32>
      %33 = arith.divf %27, %32 : vector<1x128xf32>
      %cst_38 = arith.constant 7.500000e-01 : f32
      %34 = vector.broadcast %cst_38 : f32 to vector<1x128xf32>
      %35 = arith.mulf %34, %33 : vector<1x128xf32>
      %c0_39 = arith.constant 0 : index
      %c0_40 = arith.constant 0 : index
      %36 = vector.load %arg8[%c0_39, %c0_40] : memref<1x128xf32, #tpu.memory_space<vmem>>, vector<1x128xf32>
      %cst_41 = arith.constant 2.500000e-01 : f32
      %37 = vector.broadcast %cst_41 : f32 to vector<1x128xf32>
      %38 = arith.mulf %37, %36 : vector<1x128xf32>
      %39 = arith.addf %35, %38 : vector<1x128xf32>
      %40 = vector.shape_cast %39 : vector<1x128xf32> to vector<1x1x128xf32>
      %c0_42 = arith.constant 0 : index
      %c0_43 = arith.constant 0 : index
      %c0_44 = arith.constant 0 : index
      %41 = vector.load %arg9[%c0_42, %c0_43, %c0_44] : memref<1x1x128xf32, #tpu.memory_space<vmem>>, vector<1x1x128xf32>
      tpu.vector_store %arg9[%c0_42, %c0_43, %c0_44], %40 {strides = array<i32>} : memref<1x1x128xf32, #tpu.memory_space<vmem>>, vector<1x1x128xf32>,
    } else {
    }
    return
  }
  func.func @transform_0(%arg0: i32, %arg1: i32) -> (i32, i32, i32) {
    %c0_i32 = arith.constant 0 : i32
    %c0_i32_0 = arith.constant 0 : i32
    return %arg0, %c0_i32, %arg1 : i32, i32, i32
  }
  func.func @transform_1(%arg0: i32, %arg1: i32) -> (i32, i32) {
    %c0_i32 = arith.constant 0 : i32
    %c0_i32_0 = arith.constant 0 : i32
    %c0_i32_1 = arith.constant 0 : i32
    return %c0_i32, %c0_i32_0 : i32, i32
  }
  func.func @transform_2(%arg0: i32, %arg1: i32) -> (i32, i32) {
    %c0_i32 = arith.constant 0 : i32
    %c0_i32_0 = arith.constant 0 : i32
    %c0_i32_1 = arith.constant 0 : i32
    return %c0_i32, %c0_i32_0 : i32, i32
  }
  func.func @transform_3(%arg0: i32, %arg1: i32) -> (i32, i32) {
    %c0_i32 = arith.constant 0 : i32
    %c0_i32_0 = arith.constant 0 : i32
    %c0_i32_1 = arith.constant 0 : i32
    return %c0_i32, %c0_i32_0 : i32, i32
  }
  func.func @transform_4(%arg0: i32, %arg1: i32) -> (i32, i32) {
    %c0_i32 = arith.constant 0 : i32
    %c0_i32_0 = arith.constant 0 : i32
    %c0_i32_1 = arith.constant 0 : i32
    return %c0_i32, %c0_i32_0 : i32, i32
  }
  func.func @transform_5(%arg0: i32, %arg1: i32) -> (i32, i32) {
    %c0_i32 = arith.constant 0 : i32
    %c0_i32_0 = arith.constant 0 : i32
    %c0_i32_1 = arith.constant 0 : i32
    return %c0_i32, %c0_i32_0 : i32, i32
  }
  func.func @transform_6(%arg0: i32, %arg1: i32) -> (i32, i32) {
    %c0_i32 = arith.constant 0 : i32
    %c0_i32_0 = arith.constant 0 : i32
    %c0_i32_1 = arith.constant 0 : i32
    return %c0_i32, %c0_i32_0 : i32, i32
  }
  func.func @transform_7(%arg0: i32, %arg1: i32) -> (i32, i32, i32) {
    %c0_i32 = arith.constant 0 : i32
    %c0_i32_0 = arith.constant 0 : i32
    %c0_i32_1 = arith.constant 0 : i32
    return %arg0, %c0_i32, %c0_i32_0 : i32, i32, i32
  }
}

</mosaic_0001>

<bundles_post_ra>
// kernel: tpu_custom_call.1
= control target key start
LH: loop header
LB: loop body
LE: loop exit
PB: predicated region body
PF: predicated region fallthrough
CT: control target
= control target key end

     0   :  { %s2769_s0 = inlined_call_operand.hbm [shape: f32[2,64,256], index: 0, kind: input, shape index: {}]   ;;  %s2770_s1 = inlined_call_operand.vmem [shape: f32[64,32], index: 1, kind: input, shape index: {}]   ;;  %s2771_s2 = inlined_call_operand.vmem [shape: f32[1,32], index: 2, kind: input, shape index: {}]   ;;  %s2772_s3 = inlined_call_operand.vmem [shape: f32[32,128], index: 3, kind: input, shape index: {}]   ;;  %s2773_s4 = inlined_call_operand.vmem [shape: f32[1,128], index: 4, kind: input, shape index: {}]   ;;  %s2774_s5 = inlined_call_operand.hbm [shape: f32[128,128], index: 5, kind: input, shape index: {}]   ;;  %s2775_s6 = inlined_call_operand.vmem [shape: f32[1,128], index: 6, kind: input, shape index: {}]   ;;  %s2776_s7 = inlined_call_operand.hbm [shape: f32[2,1,128], index: 7, kind: output, shape index: {}]  }
   0x1   :  { %2781 = sst [smem:[#allocation12_spill]] %s2774_s5 }
   0x2   :  { %12 = vsyncpa [#allocation4], 0 }
   0x3   :  { %14 = vsyncpa [#allocation4 + $0x1], 0 }
   0x4   :  { %15 = vsyncpa [#allocation7], 0 }
   0x5   :  { %16 = vsyncpa [#allocation5], 0 }
   0x6   :  { %18 = vsyncpa [#allocation5 + $0x1], 0  ;;  %s2252_s24 = smov 0   ;;  %s2254_s25 = smov 0  }
   0x7   :  { %s2256_s26 = smov 0   ;;  %s2258_s27 = smov 0  }
   0x8   :  { %s2260_s28 = smov 0   ;;  %s2262_s29 = smov 0  }
   0x9 LB: > { %s1429_s30 = sadd.s32 4294967295, %s2200_s29   ;;  %s1430_s8 = sadd.s32 4294967294, %s2200_s29   ;;  %s2200_s29 = sphi %s2262_s29, %s24_s29   ;;  %s2196_s28 = sphi %s2260_s28, %s2802_s28   ;;  %s2192_s27 = sphi %s2258_s27, %s2801_s27   ;;  %s2188_s26 = sphi %s2256_s26, %s2800_s26   ;;  %s2184_s25 = sphi %s2254_s25, %s2799_s25   ;;  %s2180_s24 = sphi %s2252_s24, %s2798_s24  }
   0xa   : > { %p58_p0 = scmp.ne.s32.totalorder %s2184_s25, %s2180_s24  ;;  %p2286_p1 = scmp.eq.s32.totalorder %s1429_s30, 0 }
   0xb   : > { %p2290_p2 = scmp.eq.s32.totalorder %s1429_s30, 1  ;;  %p214_p3 = scmp.eq.s32.totalorder %s1430_s8, 1 }
   0xc   : > { %s2782_s9 = scalar_select %p2286_p1, 1, 0 }
   0xd   : > { %s2783_s10 = scalar_select %p2290_p2, 1, 0 }
   0xe   : > { %p2296_p4 = por %p2286_p1, %p58_p0  ;;  %p1431_p5 = scmp.ge.s32.totalorder %s2200_s29, 1 }
   0xf   : > { %p2301_p6 = por %p214_p3, %p58_p0  ;;  %p221_p7 = scmp.lt.s32.totalorder %s2200_s29, 3 }
  0x10   : > { %s2784_s11 = scalar_select %p2296_p4, 1, 0 }
  0x11   : > { %s2785_s12 = scalar_select %p2301_p6, 1, 0 }
  0x12   : > { %p2306_p8 = pnand %p1431_p5, %p221_p7  ;;  %s2202_s14 = smov [#allocation6]  }
  0x13   : > { %s245_s15 = sshll.u32 %s2202_s14, 4  ;;  %s36_s17 = sadd.s32 1, %s2196_s28  ;;  %s246_s15 = int_to_ptr.vmem [resolvable:$true] %s245_s15 }
  0x14   : > { %s2786_s13 = scalar_select %p2306_p8, 1, 0 }
  0x15   : > { %p1982_p9 = pneg %p2306_p8  ;;  %s2788_s5 = sld [smem:[#allocation12_spill]] }
  0x17   : > { %p2315_p11 = pnand %p1982_p9, %p2286_p1 }
  0x19   : > { %p2058_p13 = pneg %p2315_p11 }
  0x1b   : > { %s2056_s20 = scalar_lea.hbm %s2788_s5, 2048 }
  0x1c   : > { %p2057_p12 = scmp.ne.s32.totalorder %s2788_s5, %s2056_s20  ;;  %p2063_p5 = scmp.lt.u32.totalorder %s2056_s20, %s2788_s5 }
  0x1e   : > { %p2059_p0 = pnand %p2058_p13, %p2057_p12 }
  0x20   : > { %p2060_p3 = pneg %p2059_p0 }
  0x22   : > { %p2065_p7 = pnand %p2063_p5, %p2060_p3 }
  0x24   : > { %2068 = shalt.err (!%p2065_p7)
}
  0x25   : > { %s2069_s8 = scalar_lea.vmem %s246_s15, 2048  ;;  %p2077_p1 = scmp.lt.s32.totalorder %s246_s15, %s246_s15 }
  0x26   : > { %p2070_p9 = scmp.ne.s32.totalorder %s246_s15, %s2069_s8  ;;  %p2078_p4 = scmp.lt.s32.totalorder %s2069_s8, %s2069_s8 }
  0x28   : > { %p2072_p10 = pnand %p2070_p9, %p2058_p13  ;;  %p2079_p8 = por %p2078_p4, %p2077_p1 }
  0x2a   : > { %p2073_p6 = pneg %p2072_p10 }
  0x2c   : > { %p2080_p2 = pnand %p2079_p8, %p2073_p6 }
  0x2e   : > { %2083 = shalt.err (!%p2080_p2)
}
  0x2f   : > { %s2203_s14 = smov 128   ;;  %s2204_s18 = smov 8  }
  0x30   : > { %1985 = dma.hbm_to_vmem [thread:$0]  (!%p2315_p11), %s2788_s5, 2048, %s246_s15, [#allocation7], %s2203_s14, %s2203_s14, %s2204_s18  }
  0x31   : > { %p38_p1 = scmp.ge.s32.totalorder %s36_s17, 2  ;;  %s45_s21 = sadd.s32 1, %s2188_s26 }
  0x32   : > { %p52_p2 = scmp.ne.s32.totalorder %s2188_s26, %s2184_s25  ;;  %p53_p4 = scmp.eq.s32.totalorder %s2200_s29, 0 }
  0x33   : > { %s2804_s17 = smov (%p38_p1, %s36_s17), 0  ;;  %p2790_p8 = scmp.ne.s32.totalorder %s2783_s10, 0 }
  0x34   : > { %p2342_p6 = por %p53_p4, %p52_p2  ;;  %s40_s16 = ssub.s32 %s2196_s28, %s2804_s17 }
  0x35   : > { %p2348_p10 = por %p2790_p8, %p52_p2  ;;  %p1995_p12 = scmp.lt.s32.totalorder %s2200_s29, 2 }
  0x36   : > { %p43_p11 = scmp.eq.s32.totalorder %s40_s16, 0  ;;  %s262_s15 = sand.u32 1, %s2188_s26  }
  0x37   : > { %s1434_s30 = sshll.u32 %s262_s15, 7  ;;  %s1445_s14 = sshll.u32 %s2196_s28, 11 }
  0x38   : > { %s2357_s8 = scalar_select %p43_p11, %s2188_s26, %s45_s21  }
  0x39   : > { %s2363_s20 = scalar_lea.hbm %s2769_s0, %s1445_s14  ;;  %s266_s10 = scalar_lea.vmem [#allocation3], %s1434_s30 }
  0x3a   : > { %s275_s5 = sshll.u32 %s266_s10, 4  ;;  %p2369_p13 = pnand %p1995_p12, %p2342_p6  ;;  %s2365_s5 = int_to_ptr.vmem [resolvable:$true] %s275_s5 }
  0x3b   : > { %s2373_s21 = scalar_lea.sflag [#allocation4], %s262_s15  ;;  %s2084_s18 = scalar_lea.hbm %s2363_s20, 2048 }
  0x3c   : > { %p2085_p0 = scmp.ne.s32.totalorder %s2363_s20, %s2084_s18  ;;  %p2086_p3 = pneg %p2369_p13 }
  0x3d   : > { %s2089_s22 = scalar_lea.hbm %s2769_s0, 4096  ;;  %p2090_p9 = scmp.lt.u32.totalorder %s2363_s20, %s2769_s0 }
  0x3e   : > { %p2087_p5 = pnand %p2086_p3, %p2085_p0  ;;  %p2091_p1 = scmp.lt.u32.totalorder %s2089_s22, %s2084_s18 }
  0x3f   : > { %p2093_p4 = scmp.lt.u32.totalorder %s2084_s18, %s2363_s20 }
  0x40   : > { %p2088_p7 = pneg %p2087_p5  ;;  %p2092_p2 = por %p2091_p1, %p2090_p9 }
  0x42   : > { %p2094_p6 = por %p2093_p4, %p2092_p2 }
  0x44   : > { %p2095_p8 = pnand %p2094_p6, %p2088_p7 }
  0x46   : > { %2098 = shalt.err (!%p2095_p8)
}
  0x47   : > { %s2099_s15 = scalar_lea.vmem %s2365_s5, 2048  ;;  %s2205_s30 = smov [#allocation3]  }
  0x48   : > { %p2100_p12 = scmp.ne.s32.totalorder %s2365_s5, %s2099_s15  ;;  %s2104_s14 = sshll.u32 %s2205_s30, 4  ;;  %s2105_s14 = int_to_ptr.vmem [resolvable:$false] %s2104_s14 }
  0x49   : > { %s2106_s19 = scalar_lea.vmem %s2105_s14, 4096  ;;  %p2107_p5 = scmp.lt.s32.totalorder %s2365_s5, %s2105_s14 }
  0x4a   : > { %p2102_p11 = pnand %p2100_p12, %p2086_p3  ;;  %p2108_p9 = scmp.lt.s32.totalorder %s2106_s19, %s2099_s15 }
  0x4c   : > { %p2103_p0 = pneg %p2102_p11  ;;  %p2109_p1 = por %p2108_p9, %p2107_p5 }
  0x4e   : > { %p2110_p2 = pnand %p2109_p1, %p2103_p0 }
  0x50   : > { %2113 = shalt.err (!%p2110_p2)
}
  0x51   : > { %s2206_s18 = smov 256   ;;  %s2207_s22 = smov 16  }
  0x52   : > { %1989 = dma.hbm_to_vmem [thread:$0]  (!%p2369_p13), %s2363_s20, 2048, %s2365_s5, %s2373_s21, %s2206_s18, %s2206_s18, %s2207_s22  }
  0x53   : > { %p2793_p3 = scmp.ne.s32.totalorder %s2786_s13, 0 }
  0x54   : > { %s2404_s10 = sand.u32 (!%p2793_p3), 1, %s2184_s25   ;;  %p2794_p7 = scmp.ne.s32.totalorder (!%p2793_p3), %s2784_s11, 0 }
  0x55   : > { %287 = sbr.rel (%p2793_p3) target bundleno = 1012 (0x3f4), region = 48  ;;  %s1438_s15 = sshll.u32 (!%p2793_p3), %s2404_s10, 7 }
  0x56   : > { %s290_s30 = scalar_lea.sflag (!%p2793_p3), [#allocation4], %s2404_s10  ;;  %s293_s14 = scalar_lea.vmem (!%p2793_p3), [#allocation3], %s1438_s15 }
  0x5c   : > { %2167 = dma.done.wait (%p2794_p7), %s290_s30, 2048  }
  0x5d   : > { %2169 = vsyncadd (%p2794_p7), %s290_s30, 4294965248  ;;  %p2795_p4 = scmp.ne.s32.totalorder %s2782_s9, 0 }
  0x5f   : > { %2171 = dma.done.wait (%p2795_p4), [#allocation7], 2048  }
  0x60   : > { %2173 = vsyncadd (%p2795_p4), [#allocation7], 4294965248  ;;  %v340_v0 = vld [vmem:[%s293_s14] sm:$0xff]  ;;  %v372_v1 = vld [vmem:[%s293_s14 + $0x8] sm:$0xff]  ;;  %v2208_v27 = vmov 0.0|0.0   ;;  %vm2209_vm0 = vmmov 0   ;;  %v456_v41 = vlaneseq }
  0x61   : > { %v342_v2 = vld [vmem:[%s293_s14 + $0x20] sm:$0xff]  ;;  %v388_v3 = vadd.f32 %v372_v1, %v340_v0  ;;  %v374_v4 = vld [vmem:[%s293_s14 + $0x28] sm:$0xff]  ;;  %v341_v5 = vld [vmem:[%s293_s14 + $0x10] sm:$0xff]  ;;  %1802 = vmatprep.subr.bf16.mxu0 %v2208_v27  ;;  %1814 = vmatprep.subr.bf16.mxu1 %v2208_v27  ;;  %v2210_v37 = vmov 0.0   ;;  %vm467_vm1 = vcmask 130112   ;;  %vm474_vm2 = vcmask 195712  }
  0x62   : > { %v373_v6 = vld [vmem:[%s293_s14 + $0x18] sm:$0xff]  ;;  %v390_v7 = vadd.f32 %v374_v4, %v342_v2  ;;  %v343_v8 = vld [vmem:[%s293_s14 + $0x30] sm:$0xff]  ;;  %v344_v12 = vld [vmem:[%s293_s14 + $0x40] sm:$0xff]  ;;  %1578 = vmatprep.mubr.msk.f32.mxu0 %vm2209_vm0, %v2210_v37  ;;  %1589 = vmatprep.mubr.msk.f32.mxu1 %vm2209_vm0, %v2210_v37  ;;  %v457_v42 = vand.u32 127, %v456_v41  ;;  %v459_v43 = vshrl.u32 %v456_v41, 7  ;;  %vm481_vm3 = vcmask 261312  }
  0x63   : > { %v375_v9 = vld [vmem:[%s293_s14 + $0x38] sm:$0xff]  ;;  %415 = vadd.xlane.f32.xlu0 %v388_v3  ;;  %v389_v10 = vadd.f32 %v373_v6, %v341_v5  ;;  %v376_v13 = vld [vmem:[%s293_s14 + $0x48] sm:$0xff]  ;;  %v345_v14 = vld [vmem:[%s293_s14 + $0x50] sm:$0xff]  ;;  %vm488_vm4 = vcmask 326912   ;;  %vm495_vm5 = vcmask 392512   ;;  %vm502_vm6 = vcmask 458112  }
  0x64   : > { %419 = vadd.xlane.f32.xlu1 %v390_v7  ;;  %v391_v11 = vadd.f32 %v375_v9, %v343_v8  ;;  %v377_v15 = vld [vmem:[%s293_s14 + $0x58] sm:$0xff]  ;;  %v392_v16 = vadd.f32 %v376_v13, %v344_v12  ;;  %v346_v18 = vld [vmem:[%s293_s14 + $0x60] sm:$0xff]  ;;  %v378_v19 = vld [vmem:[%s293_s14 + $0x68] sm:$0xff]  ;;  %v462_v44 = vadd.s32 4294967288, %v457_v42  ;;  %v469_v46 = vadd.s32 4294967280, %v457_v42  ;;  %s1442_s20 = sshll.u32 %s2192_s27, 4 }
  0x65   : > { %v393_v17 = vadd.f32 %v377_v15, %v345_v14  ;;  %v347_v20 = vld [vmem:[%s293_s14 + $0x70] sm:$0xff]  ;;  %v379_v21 = vld [vmem:[%s293_s14 + $0x78] sm:$0xff]  ;;  %v394_v22 = vadd.f32 %v378_v19, %v346_v18  ;;  %v439_v24 = vld [vmem:[%s2770_s1] sm:$0xff]  ;;  %v476_v47 = vadd.s32 4294967272, %v457_v42  ;;  %v460_v49 = vsub.s32 %v457_v42, %v459_v43  ;;  %s326_s16 = scalar_lea.vmem [#allocation8], %s2404_s10  ;;  %s2720_s22 = scalar_lea.hbm %s2776_s7, %s1442_s20 }
  0x66   : > { %v395_v23 = vadd.f32 %v379_v21, %v347_v20  ;;  %v440_v25 = vld [vmem:[%s2770_s1 + $0x8] sm:$0xff]  ;;  %v441_v28 = vld [vmem:[%s2770_s1 + $0x10] sm:$0xff]  ;;  %v442_v29 = vld [vmem:[%s2770_s1 + $0x18] sm:$0xff]  ;;  %v465_v51 = vsub.s32 %v462_v44, %v459_v43  ;;  %v483_v52 = vadd.s32 4294967264, %v457_v42  ;;  %v472_v53 = vsub.s32 %v469_v46, %v459_v43  ;;  %s1342_s21 = sshll.u32 %s326_s16, 4  ;;  %s1330_s15 = scalar_lea.sflag [#allocation5], %s2404_s10  ;;  %s2722_s21 = int_to_ptr.vmem [resolvable:$true] %s1342_s21 }
  0x67   : > { %417 = vadd.xlane.f32.xlu0 %v389_v10  ;;  %v1803_v26 = vpack.c.bf16 %v440_v25, %v439_v24  ;;  %v1806_v30 = vpack.c.bf16 %v442_v29, %v441_v28  ;;  %v443_v31 = vld [vmem:[%s2770_s1 + $0x20] sm:$0xff]  ;;  %v444_v32 = vld [vmem:[%s2770_s1 + $0x28] sm:$0xff]  ;;  %v445_v34 = vld [vmem:[%s2770_s1 + $0x30] sm:$0xff]  ;;  %v479_v56 = vsub.s32 %v476_v47, %v459_v43  ;;  %v490_v57 = vadd.s32 4294967256, %v457_v42  ;;  %s2114_s30 = scalar_lea.vmem %s2722_s21, 16  ;;  %s2211_s27 = smov [#allocation8]  }
  0x68   : > { %421 = vadd.xlane.f32.xlu1 %v391_v11  ;;  %v1809_v33 = vpack.c.bf16 %v444_v32, %v443_v31  ;;  %v446_v35 = vld [vmem:[%s2770_s1 + $0x38] sm:$0xff]  ;;  %v585_v38 = vld [vmem:[%s2772_s3] sm:$0xff]  ;;  %v586_v39 = vld [vmem:[%s2772_s3 + $0x8] sm:$0xff]  ;;  %v486_v63 = vsub.s32 %v483_v52, %v459_v43  ;;  %v497_v0 = vadd.s32 4294967248, %v457_v42  ;;  %v504_v5 = vadd.s32 4294967240, %v457_v42  ;;  %p2115_p13 = scmp.ne.s32.totalorder %s2722_s21, %s2114_s30  ;;  %s2118_s14 = sshll.u32 %s2211_s27, 4  ;;  %s2119_s14 = int_to_ptr.vmem [resolvable:$false] %s2118_s14 }
  0x69   : > { %1804 = vmatpush3.bf16.msra.mxu0 %v1803_v26  ;;  %v1812_v36 = vpack.c.bf16 %v446_v35, %v445_v34  ;;  %v1815_v40 = vpack.c.bf16 %v586_v39, %v585_v38  ;;  %v493_v4 = vsub.s32 %v490_v57, %v459_v43  ;;  %vm509_vm7 = vcmask 523712   ;;  %v587_v26 = vld [vmem:[%s2772_s3 + $0x10] sm:$0xff]  ;;  %v588_v28 = vld [vmem:[%s2772_s3 + $0x18] sm:$0xff]  ;;  %v666_v31 = vld [vmem:[#allocation6 + $0x8] sm:$0xff]  ;;  %s2120_s5 = scalar_lea.vmem %s2119_s14, 32  ;;  %p2121_p12 = scmp.lt.s32.totalorder %s2722_s21, %s2119_s14 }
  0x6a   : > { %1805 = vmatprep.subr.bf16.mxu0 %v2208_v27  ;;  %v500_v13 = vsub.s32 %v497_v0, %v459_v43  ;;  %vm511_vm8 = vcmask 523264   ;;  %v1818_v29 = vpack.c.bf16 %v588_v28, %v587_v26  ;;  %v667_v34 = vld [vmem:[#allocation6 + $0x10] sm:$0xff]  ;;  %v668_v35 = vld [vmem:[#allocation6 + $0x18] sm:$0xff]  ;;  %v669_v44 = vld [vmem:[#allocation6 + $0x20] sm:$0xff]  ;;  %vm590_vm9 = vcmask 261120   ;;  %p2116_p6 = pnand %p2115_p13, %p2348_p10  ;;  %p2122_p11 = scmp.lt.s32.totalorder %s2120_s5, %s2114_s30 }
  0x6b   : > { %423 = vadd.xlane.f32.xlu0 %v392_v16  ;;  %1816 = vmatpush3.bf16.msra.mxu1 %v1815_v40  ;;  %v507_v16 = vsub.s32 %v504_v5, %v459_v43  ;;  %v688_v40 = vand.u32 4294901760, %v667_v34  ;;  %v691_v41 = vand.u32 4294901760, %v668_v35  ;;  %v694_v47 = vand.u32 4294901760, %v669_v44  ;;  %v672_v52 = vld [vmem:[#allocation6 + $0x38] sm:$0xff] }
  0x6c   : > { %425 = vadd.xlane.f32.xlu1 %v393_v17  ;;  %1817 = vmatprep.subr.bf16.mxu1 %v2208_v27  ;;  %p2117_p8 = pneg %p2116_p6  ;;  %p2123_p0 = por %p2122_p11, %p2121_p12 }
  0x6d   : > { %1807 = vmatpush3.bf16.msra.mxu0 %v1806_v30  ;;  %v665_v30 = vld [vmem:[#allocation6] sm:$0xff]  ;;  %v2474_v42 = vsub.f32 %v667_v34, %v688_v40  ;;  %v2476_v43 = vsub.f32 %v668_v35, %v691_v41  ;;  %v2479_v46 = vpack.c.bf16 %v691_v41, %v688_v40 }
  0x6e   : > { %1808 = vmatprep.subr.bf16.mxu0 %v2208_v27  ;;  %v682_v32 = vand.u32 4294901760, %v665_v30  ;;  %p2124_p5 = pnand %p2123_p0, %p2117_p8 }
  0x6f   : > { %427 = vadd.xlane.f32.xlu0 %v394_v22  ;;  %1819 = vmatpush3.bf16.msra.mxu1 %v1818_v29  ;;  %v789_v40 = vand.u32 4294901760, %v2474_v42  ;;  %v796_v41 = vand.u32 4294901760, %v2476_v43 }
  0x70   : > { %429 = vadd.xlane.f32.xlu1 %v395_v23  ;;  %1892 = vmatprep.subr.bf16.mxu1 %v2208_v27  ;;  %v2469_v38 = vsub.f32 %v665_v30, %v682_v32 }
  0x71   : > { %1810 = vmatpush3.bf16.msra.mxu0 %v1809_v33  ;;  %v685_v33 = vand.u32 4294901760, %v666_v31 }
  0x72   : > { %1811 = vmatprep.subr.bf16.mxu0 %v2208_v27  ;;  %v775_v29 = vand.u32 4294901760, %v2469_v38 }
  0x73   : > { %v2471_v39 = vsub.f32 %v666_v31, %v685_v33 }
  0x75   : > { %1813 = vmatpush3.bf16.msra.mxu0 %v1812_v36  ;;  %v2467_v36 = vpack.c.bf16 %v685_v33, %v682_v32  ;;  %v782_v30 = vand.u32 4294901760, %v2471_v39  ;;  %v776_v32 = vsub.f32 %v2469_v38, %v775_v29 }
  0x76   : > { %1820 = vmatprep.subr.bf16.mxu0 %v2208_v27 }
  0x77   : > { %v2554_v31 = vpack.c.bf16 %v782_v30, %v775_v29  ;;  %v783_v33 = vsub.f32 %v2471_v39, %v782_v30  ;;  %v777_v34 = vand.u32 4294901760, %v776_v32 }
  0x79   : > { %v784_v35 = vand.u32 4294901760, %v783_v33 }
  0xf0   : > { %v416_v45 = vpop.xlane.xlu0 %415 }
  0xf1   : > { %v420_v48 = vpop.xlane.xlu1 %419  ;;  %v431_v50 = vmul.f32 0.00390625, %v416_v45  ;;  %v670_v45 = vld [vmem:[#allocation6 + $0x28] sm:$0xff] }
  0xf2   : > { %v433_v54 = vmul.f32 0.00390625, %v420_v48  ;;  %v697_v48 = vand.u32 4294901760, %v670_v45 }
  0xf3   : > { %v461_v61 = vrot.slane %v431_v50, %v460_v49  ;;  %v2482_v49 = vsub.f32 %v669_v44, %v694_v47  ;;  %v2560_v44 = vpack.c.bf16 %v784_v35, %v777_v34 }
  0xf4   : > { %v418_v55 = vpop.xlane.xlu0 %417  ;;  %v473_v1 = vrot.slane %v433_v54, %v472_v53  ;;  %v2484_v50 = vsub.f32 %v670_v45, %v697_v48  ;;  %v2487_v53 = vpack.c.bf16 %v697_v48, %v694_v47  ;;  %v2562_v45 = vpack.c.bf16 %v796_v41, %v789_v40 }
  0xf5   : > { %v432_v58 = vmul.f32 0.00390625, %v418_v55  ;;  %v422_v59 = vpop.xlane.xlu1 %421  ;;  %v703_v55 = vand.u32 4294901760, %v672_v52  ;;  %v790_v47 = vsub.f32 %v2474_v42, %v789_v40  ;;  %v797_v48 = vsub.f32 %v2476_v43, %v796_v41 }
  0xf6   : > { %v434_v60 = vmul.f32 0.00390625, %v422_v59  ;;  %v674_v59 = vld [vmem:[#allocation6 + $0x48] sm:$0xff] }
  0xf7   : > { %v466_v62 = vrot.slane %v432_v58, %v465_v51  ;;  %v671_v51 = vld [vmem:[#allocation6 + $0x30] sm:$0xff]  ;;  %v2492_v57 = vsub.f32 %v672_v52, %v703_v55  ;;  %v673_v58 = vld [vmem:[#allocation6 + $0x40] sm:$0xff]  ;;  %v798_v52 = vand.u32 4294901760, %v797_v48 }
  0xf8   : > { %v480_v2 = vrot.slane %v434_v60, %v479_v56  ;;  %v424_v3 = vpop.xlane.xlu0 %423  ;;  %v700_v54 = vand.u32 4294901760, %v671_v51 }
  0xf9   : > { %v468_v6 = vsel %vm467_vm1, %v466_v62, %v461_v61  ;;  %v435_v7 = vmul.f32 0.00390625, %v424_v3  ;;  %v426_v8 = vpop.xlane.xlu1 %425  ;;  %v706_v61 = vand.u32 4294901760, %v673_v58  ;;  %v709_v62 = vand.u32 4294901760, %v674_v59 }
  0xfa   : > { %v475_v9 = vsel %vm474_vm2, %v473_v1, %v468_v6  ;;  %v436_v10 = vmul.f32 0.00390625, %v426_v8  ;;  %v2490_v56 = vsub.f32 %v671_v51, %v700_v54  ;;  %v2495_v60 = vpack.c.bf16 %v703_v55, %v700_v54  ;;  %v675_v1 = vld [vmem:[#allocation6 + $0x50] sm:$0xff] }
  0xfb   : > { %v482_v11 = vsel %vm481_vm3, %v480_v2, %v475_v9  ;;  %v487_v12 = vrot.slane %v435_v7, %v486_v63  ;;  %v2498_v63 = vsub.f32 %v673_v58, %v706_v61  ;;  %v2500_v0 = vsub.f32 %v674_v59, %v709_v62  ;;  %v676_v2 = vld [vmem:[#allocation6 + $0x58] sm:$0xff]  ;;  %v447_v9 = vld [vmem:[%s2771_s2] sm:$0x1] }
  0xfc   : > { %v494_v14 = vrot.slane %v436_v10, %v493_v4  ;;  %v428_v15 = vpop.xlane.xlu0 %427  ;;  %v2503_v3 = vpack.c.bf16 %v709_v62, %v706_v61  ;;  %v712_v4 = vand.u32 4294901760, %v675_v1  ;;  %v715_v5 = vand.u32 4294901760, %v676_v2 }
  0xfd   : > { %v489_v17 = vsel %vm488_vm4, %v487_v12, %v482_v11  ;;  %v437_v18 = vmul.f32 0.00390625, %v428_v15  ;;  %v430_v19 = vpop.xlane.xlu1 %429  ;;  %v678_v15 = vld [vmem:[#allocation6 + $0x68] sm:$0xff]  ;;  %v791_v51 = vand.u32 4294901760, %v790_v47  ;;  %v803_v54 = vand.u32 4294901760, %v2482_v49 }
  0xfe   : > { %v438_v20 = vmul.f32 0.00390625, %v430_v19  ;;  %v496_v22 = vsel %vm495_vm5, %v494_v14, %v489_v17  ;;  %v2506_v6 = vsub.f32 %v675_v1, %v712_v4  ;;  %v2508_v7 = vsub.f32 %v676_v2, %v715_v5  ;;  %v677_v14 = vld [vmem:[#allocation6 + $0x60] sm:$0xff]  ;;  %v679_v19 = vld [vmem:[#allocation6 + $0x70] sm:$0xff] }
  0xff   : > { %v501_v21 = vrot.slane %v437_v18, %v500_v13  ;;  %v2511_v8 = vpack.c.bf16 %v715_v5, %v712_v4  ;;  %v721_v17 = vand.u32 4294901760, %v678_v15  ;;  %v810_v55 = vand.u32 4294901760, %v2484_v50 }
 0x100   : > { %v508_v23 = vrot.slane %v438_v20, %v507_v16  ;;  %v718_v16 = vand.u32 4294901760, %v677_v14  ;;  %v680_v20 = vld [vmem:[#allocation6 + $0x78] sm:$0xff]  ;;  %v2568_v58 = vpack.c.bf16 %v798_v52, %v791_v51  ;;  %v804_v61 = vsub.f32 %v2482_v49, %v803_v54 }
 0x101   : > { %v503_v24 = vsel %vm502_vm6, %v501_v21, %v496_v22  ;;  %v724_v21 = vand.u32 4294901760, %v679_v19  ;;  %v727_v22 = vand.u32 4294901760, %v680_v20  ;;  %v2570_v59 = vpack.c.bf16 %v810_v55, %v803_v54 }
 0x102   : > { %v510_v25 = vsel %vm509_vm7, %v508_v23, %v503_v24  ;;  %v2532_v18 = vpack.c.bf16 %v721_v17, %v718_v16  ;;  %v2540_v24 = vsub.f32 %v677_v14, %v718_v16  ;;  %v811_v62 = vsub.f32 %v2484_v50, %v810_v55 }
 0x103   : > { %1579 = vmatmul.mubr.msk.f32.vlgmr.msra.gmra.mrb[0].mxu0 %vm511_vm8, %v510_v25  ;;  %v2538_v23 = vpack.c.bf16 %v727_v22, %v724_v21  ;;  %v2542_v25 = vsub.f32 %v678_v15, %v721_v17  ;;  %v2544_v26 = vsub.f32 %v679_v19, %v724_v21  ;;  %v2546_v28 = vsub.f32 %v680_v20, %v727_v22 }
 0x104   : > { %1624 = vmatprep.mubr.msk.f32.mxu0 %vm2209_vm0, %v2210_v37  ;;  %1822 = vmatpush3.bf16.msra.mxu0 %v2467_v36  ;;  %v805_v1 = vand.u32 4294901760, %v804_v61  ;;  %v812_v2 = vand.u32 4294901760, %v811_v62  ;;  %v817_v4 = vand.u32 4294901760, %v2490_v56  ;;  %v824_v5 = vand.u32 4294901760, %v2492_v57 }
 0x105   : > { %1823 = vmatprep.subr.bf16.mxu0 %v2208_v27  ;;  %v831_v15 = vand.u32 4294901760, %v2498_v63  ;;  %v838_v16 = vand.u32 4294901760, %v2500_v0  ;;  %v845_v30 = vand.u32 4294901760, %v2506_v6  ;;  %v852_v32 = vand.u32 4294901760, %v2508_v7 }
 0x106   : > { %v859_v48 = vand.u32 4294901760, %v2540_v24  ;;  %v866_v51 = vand.u32 4294901760, %v2542_v25 }
 0x107   : > { %v2586_v19 = vpack.c.bf16 %v838_v16, %v831_v15  ;;  %v832_v20 = vsub.f32 %v2498_v63, %v831_v15  ;;  %v839_v21 = vsub.f32 %v2500_v0, %v838_v16  ;;  %v1932_v34 = vpack.c.bf16 %v852_v32, %v845_v30 }
 0x108   : > { %1825 = vmatpush3.bf16.msra.mxu0 %v2479_v46  ;;  %v846_v35 = vsub.f32 %v2506_v6, %v845_v30  ;;  %v853_v40 = vsub.f32 %v2508_v7, %v852_v32  ;;  %v1935_v54 = vpack.c.bf16 %v866_v51, %v859_v48  ;;  %v860_v55 = vsub.f32 %v2540_v24, %v859_v48 }
 0x109   : > { %1826 = vmatprep.subr.bf16.mxu0 %v2208_v27  ;;  %v833_v22 = vand.u32 4294901760, %v832_v20  ;;  %v840_v29 = vand.u32 4294901760, %v839_v21  ;;  %v867_v61 = vsub.f32 %v2542_v25, %v866_v51  ;;  %v1869_v20 = vpack.c.bf16 %v2471_v39, %v2469_v38  ;;  %v589_v39 = vld [vmem:[%s2773_s4] sm:$0x1] }
 0x10a   : > { %v847_v41 = vand.u32 4294901760, %v846_v35  ;;  %v854_v47 = vand.u32 4294901760, %v853_v40  ;;  %v861_v62 = vand.u32 4294901760, %v860_v55  ;;  %v1872_v21 = vpack.c.bf16 %v2476_v43, %v2474_v42 }
 0x10b   : > { %v1857_v33 = vpack.c.bf16 %v840_v29, %v833_v22  ;;  %v1875_v22 = vpack.c.bf16 %v2484_v50, %v2482_v49  ;;  %v1878_v29 = vpack.c.bf16 %v2492_v57, %v2490_v56  ;;  %v1881_v30 = vpack.c.bf16 %v2500_v0, %v2498_v63 }
 0x10c   : > { %1828 = vmatpush3.bf16.msra.mxu0 %v2487_v53  ;;  %v1860_v52 = vpack.c.bf16 %v854_v47, %v847_v41  ;;  %v1884_v32 = vpack.c.bf16 %v2508_v7, %v2506_v6  ;;  %v1887_v35 = vpack.c.bf16 %v2542_v25, %v2540_v24  ;;  %v1890_v38 = vpack.c.bf16 %v2546_v28, %v2544_v26 }
 0x10d   : > { %1829 = vmatprep.subr.bf16.mxu0 %v2208_v27 }
 0x110   : > { %1831 = vmatpush3.bf16.msra.mxu0 %v2495_v60 }
 0x111   : > { %1832 = vmatprep.subr.bf16.mxu0 %v2208_v27 }
 0x114   : > { %1834 = vmatpush3.bf16.msra.mxu0 %v2503_v3 }
 0x115   : > { %1835 = vmatprep.subr.bf16.mxu0 %v2208_v27 }
 0x118   : > { %1837 = vmatpush3.bf16.msra.mxu0 %v2511_v8 }
 0x119   : > { %1838 = vmatprep.subr.bf16.mxu0 %v2208_v27 }
 0x11c   : > { %1840 = vmatpush3.bf16.msra.mxu0 %v2532_v18 }
 0x11d   : > { %1841 = vmatprep.subr.bf16.mxu0 %v2208_v27 }
 0x120   : > { %1843 = vmatpush3.bf16.msra.mxu0 %v2538_v23 }
 0x121   : > { %1844 = vmatprep.subr.bf16.mxu0 %v2208_v27 }
 0x1d6   : > { %v580_v10 = vpop.f32.mrb[0].mxu0 }
 0x1d7   : > { %v581_v11 = vadd.f32 %v580_v10, %v447_v9  ;;  %v1580_v12 = vpop.f32.mrb[1].mxu0  ;;  %v2576_v9 = vpack.c.bf16 %v812_v2, %v805_v1  ;;  %v2578_v10 = vpack.c.bf16 %v824_v5, %v817_v4  ;;  %v868_v1 = vand.u32 4294901760, %v867_v61 }
 0x1d8   : > { %v825_v12 = vsub.f32 %v2492_v57, %v824_v5  ;;  %v873_v2 = vand.u32 4294901760, %v2544_v26 }
 0x1d9   : > { %v584_v13 = vmax.f32 %v581_v11, 0.0  ;;  %v818_v11 = vsub.f32 %v2490_v56, %v817_v4  ;;  %v880_v4 = vand.u32 4294901760, %v2546_v28  ;;  %v1863_v5 = vpack.c.bf16 %v868_v1, %v861_v62 }
 0x1da   : > { %v826_v14 = vand.u32 4294901760, %v825_v12  ;;  %v874_v12 = vsub.f32 %v2544_v26, %v873_v2 }
 0x1db   : > { %1590 = vmatmul.mubr.msk.f32.vlgmr.msra.gmra.mrb[0].mxu1 %vm590_vm9, %v584_v13  ;;  %v819_v13 = vand.u32 4294901760, %v818_v11  ;;  %v1938_v11 = vpack.c.bf16 %v880_v4, %v873_v2 }
 0x1dc   : > { %1894 = vmatpush3.bf16.msra.mxu1 %v2467_v36  ;;  %1729 = vmatprep.mubr.msk.f32.mxu1 %vm2209_vm0, %v2210_v37 }
 0x1dd   : > { %1895 = vmatprep.subr.bf16.mxu1 %v2208_v27  ;;  %v2584_v17 = vpack.c.bf16 %v826_v14, %v819_v13  ;;  %v881_v13 = vsub.f32 %v2546_v28, %v880_v4  ;;  %v875_v14 = vand.u32 4294901760, %v874_v12 }
 0x1df   : > { %v882_v15 = vand.u32 4294901760, %v881_v13 }
 0x1e0   : > { %1897 = vmatpush3.bf16.msra.mxu1 %v2479_v46 }
 0x1e1   : > { %1898 = vmatprep.subr.bf16.mxu1 %v2208_v27  ;;  %v1866_v16 = vpack.c.bf16 %v882_v15, %v875_v14 }
 0x1e4   : > { %1900 = vmatpush3.bf16.msra.mxu1 %v2487_v53 }
 0x1e5   : > { %1901 = vmatprep.subr.bf16.mxu1 %v2208_v27 }
 0x1e8   : > { %1903 = vmatpush3.bf16.msra.mxu1 %v2495_v60 }
 0x1e9   : > { %1904 = vmatprep.subr.bf16.mxu1 %v2208_v27 }
 0x1ec   : > { %1906 = vmatpush3.bf16.msra.mxu1 %v2503_v3 }
 0x1ed   : > { %1907 = vmatprep.subr.bf16.mxu1 %v2208_v27 }
 0x1f0   : > { %1909 = vmatpush3.bf16.msra.mxu1 %v2511_v8 }
 0x1f1   : > { %1910 = vmatprep.subr.bf16.mxu1 %v2208_v27 }
 0x1f4   : > { %1912 = vmatpush3.bf16.msra.mxu1 %v2532_v18 }
 0x1f5   : > { %1913 = vmatprep.subr.bf16.mxu1 %v2208_v27 }
 0x1f8   : > { %1915 = vmatpush3.bf16.msra.mxu1 %v2538_v23 }
 0x1f9   : > { %1916 = vmatprep.subr.bf16.mxu1 %v2208_v27 }
 0x2ae   : > { %v660_v40 = vpop.f32.mrb[0].mxu1 }
 0x2af   : > { %v2621_v41 = vadd.f32 %v660_v40, %v589_v39  ;;  %v1591_v47 = vpop.f32.mrb[1].mxu1 }
 0x2b1   : > { %v664_v48 = vand.u32 2147483647, %v2621_v41 }
 0x2b3   : > { %v2624_v51 = vand.u32 4294901760, %v664_v48 }
 0x2b5   : > { %v2627_v55 = vsub.f32 %v664_v48, %v2624_v51 }
 0x2b7   : > { %v764_v61 = vand.u32 4294901760, %v2627_v55 }
 0x2b9   : > { %1730 = vmatmul.mubr.f32.vlgmr.msra.gmra.mrb[2].mxu1 %v764_v61  ;;  %v765_v62 = vsub.f32 %v2627_v55, %v764_v61 }
 0x2ba   : > { %1918 = vmatpush3.bf16.msra.mxu1 %v2554_v31  ;;  %1764 = vmatprep.mubr.msk.f32.mxu1 %vm2209_vm0, %v2210_v37 }
 0x2bb   : > { %1919 = vmatprep.subr.bf16.mxu1 %v2208_v27  ;;  %v766_v1 = vand.u32 4294901760, %v765_v62 }
 0x2bd   : > { %1625 = vmatmul.mubr.f32.vlgmr.msra.gmra.mrb[2].mxu0 %v766_v1 }
 0x2be   : > { %1846 = vmatpush3.bf16.msra.mxu0 %v2560_v44  ;;  %1921 = vmatpush3.bf16.msra.mxu1 %v2562_v45 }
 0x2bf   : > { %1847 = vmatprep.subr.bf16.mxu0 %v2208_v27  ;;  %1922 = vmatprep.subr.bf16.mxu1 %v2208_v27 }
 0x2c0   : > { %1659 = vmatprep.mubr.msk.f32.mxu0 %vm2209_vm0, %v2210_v37 }
 0x2c2   : > { %1849 = vmatpush3.bf16.msra.mxu0 %v2568_v58  ;;  %1924 = vmatpush3.bf16.msra.mxu1 %v2570_v59 }
 0x2c3   : > { %1850 = vmatprep.subr.bf16.mxu0 %v2208_v27  ;;  %1925 = vmatprep.subr.bf16.mxu1 %v2208_v27 }
 0x2c6   : > { %1852 = vmatpush3.bf16.msra.mxu0 %v2576_v9  ;;  %1927 = vmatpush3.bf16.msra.mxu1 %v2578_v10 }
 0x2c7   : > { %1853 = vmatprep.subr.bf16.mxu0 %v2208_v27  ;;  %1928 = vmatprep.subr.bf16.mxu1 %v2208_v27 }
 0x2ca   : > { %1855 = vmatpush3.bf16.msra.mxu0 %v2584_v17  ;;  %1930 = vmatpush3.bf16.msra.mxu1 %v2586_v19 }
 0x2cb   : > { %1856 = vmatprep.subr.bf16.mxu0 %v2208_v27  ;;  %1931 = vmatprep.subr.bf16.mxu1 %v2208_v27 }
 0x2ce   : > { %1858 = vmatpush3.bf16.msra.mxu0 %v1857_v33  ;;  %1933 = vmatpush3.bf16.msra.mxu1 %v1932_v34 }
 0x2cf   : > { %1859 = vmatprep.subr.bf16.mxu0 %v2208_v27  ;;  %1934 = vmatprep.subr.bf16.mxu1 %v2208_v27 }
 0x2d2   : > { %1861 = vmatpush3.bf16.msra.mxu0 %v1860_v52  ;;  %1936 = vmatpush3.bf16.msra.mxu1 %v1935_v54 }
 0x2d3   : > { %1862 = vmatprep.subr.bf16.mxu0 %v2208_v27  ;;  %1937 = vmatprep.subr.bf16.mxu1 %v2208_v27 }
 0x2d6   : > { %1864 = vmatpush3.bf16.msra.mxu0 %v1863_v5  ;;  %1939 = vmatpush3.bf16.msra.mxu1 %v1938_v11 }
 0x2d7   : > { %1865 = vmatprep.subr.bf16.mxu0 %v2208_v27  ;;  %1940 = vmatprep.subr.bf16.mxu1 %v2208_v27 }
 0x2d9   : > { %1765 = vmatmul.mubr.f32.vlgmr.msra.gmra.mrb[2].mxu1 %v2624_v51 }
 0x2da   : > { %1867 = vmatpush3.bf16.msra.mxu0 %v1866_v16  ;;  %1942 = vmatpush3.bf16.msra.mxu1 %v2467_v36 }
 0x2db   : > { %1868 = vmatprep.subr.bf16.mxu0 %v2208_v27  ;;  %1943 = vmatprep.subr.bf16.mxu1 %v2208_v27 }
 0x2dc   : > { %1799 = vmatprep.mubr.msk.f32.mxu1 %vm2209_vm0, %v2210_v37 }
 0x2dd   : > { %1660 = vmatmul.mubr.f32.vlgmr.msra.gmra.mrb[2].mxu0 %v2624_v51 }
 0x2de   : > { %1870 = vmatpush3.bf16.msra.mxu0 %v1869_v20  ;;  %1945 = vmatpush3.bf16.msra.mxu1 %v2479_v46 }
 0x2df   : > { %1871 = vmatprep.subr.bf16.mxu0 %v2208_v27  ;;  %1946 = vmatprep.subr.bf16.mxu1 %v2208_v27 }
 0x2e0   : > { %1694 = vmatprep.mubr.msk.f32.mxu0 %vm2209_vm0, %v2210_v37 }
 0x2e2   : > { %1873 = vmatpush3.bf16.msra.mxu0 %v1872_v21  ;;  %1948 = vmatpush3.bf16.msra.mxu1 %v2487_v53 }
 0x2e3   : > { %1874 = vmatprep.subr.bf16.mxu0 %v2208_v27  ;;  %1949 = vmatprep.subr.bf16.mxu1 %v2208_v27 }
 0x2e6   : > { %1876 = vmatpush3.bf16.msra.mxu0 %v1875_v22  ;;  %1951 = vmatpush3.bf16.msra.mxu1 %v2495_v60 }
 0x2e7   : > { %1877 = vmatprep.subr.bf16.mxu0 %v2208_v27  ;;  %1952 = vmatprep.subr.bf16.mxu1 %v2208_v27 }
 0x2ea   : > { %1879 = vmatpush3.bf16.msra.mxu0 %v1878_v29  ;;  %1954 = vmatpush3.bf16.msra.mxu1 %v2503_v3 }
 0x2eb   : > { %1880 = vmatprep.subr.bf16.mxu0 %v2208_v27  ;;  %1955 = vmatprep.subr.bf16.mxu1 %v2208_v27 }
 0x2ee   : > { %1882 = vmatpush3.bf16.msra.mxu0 %v1881_v30  ;;  %1957 = vmatpush3.bf16.msra.mxu1 %v2511_v8 }
 0x2ef   : > { %1883 = vmatprep.subr.bf16.mxu0 %v2208_v27  ;;  %1958 = vmatprep.subr.bf16.mxu1 %v2208_v27 }
 0x2f2   : > { %1885 = vmatpush3.bf16.msra.mxu0 %v1884_v32  ;;  %1960 = vmatpush3.bf16.msra.mxu1 %v2532_v18 }
 0x2f3   : > { %1886 = vmatprep.subr.bf16.mxu0 %v2208_v27  ;;  %1961 = vmatprep.subr.bf16.mxu1 %v2208_v27 }
 0x2f6   : > { %1888 = vmatpush3.bf16.msra.mxu0 %v1887_v35  ;;  %1963 = vmatpush3.bf16.msra.mxu1 %v2538_v23 }
 0x2f7   : > { %1889 = vmatprep.subr.bf16.mxu0 %v2208_v27  ;;  %v1325_v27 = vld [vmem:[%s2775_s6] sm:$0x1] }
 0x2f8   : > { %v1326_v56 = vmul.f32 0.25, %v1325_v27 }
 0x2f9   : > { %1800 = vmatmul.mubr.f32.vlgmr.msra.gmra.mrb[2].mxu1 %v2624_v51 }
 0x2fa   : > { %1891 = vmatpush3.bf16.msra.mxu0 %v1890_v38 }
 0x2fd   : > { %1695 = vmatmul.mubr.f32.vlgmr.msra.gmra.mrb[2].mxu0 %v2627_v55 }
 0x3cc   : > { %v1318_v37 = vpop.f32.mrb[2].mxu1 }
 0x3cd   : > { %v1801_v36 = vpop.f32.mrb[3].mxu1 }
 0x3d0   : > { %v1023_v42 = vpop.f32.mrb[2].mxu0 }
 0x3d1   : > { %v1964_v43 = vadd.f32 0.001, %v1023_v42  ;;  %v1696_v46 = vpop.f32.mrb[3].mxu0 }
 0x3d3   : > { %v1965_v49 = vadd.f32 %v1964_v43, %v1318_v37 }
 0x3d5   : > { %2054 = vrcp.f32 %v1965_v49 }
 0x3df   : > { %v2055_v50 = vpop.eup %2054 }
 0x3e0   : > { %v1323_v53 = vmul.f32 %v2055_v50, %v2621_v41 }
 0x3e2   : > { %v1324_v57 = vmul.f32 0.75, %v1323_v53 }
 0x3e4   : > { %v1327_v60 = vadd.f32 %v1326_v56, %v1324_v57 }
 0x3e6   : > { %1328 = vst [vmem:[%s326_s16] sm:$0x1] %v1327_v60 }
 0x3e7   : > { %2127 = shalt.err (!%p2124_p5)
}
 0x3e8   : > { %s2128_s10 = scalar_lea.hbm %s2720_s22, 16  ;;  %s2132_s13 = scalar_lea.hbm %s2776_s7, 32 }
 0x3e9   : > { %p2129_p9 = scmp.ne.s32.totalorder %s2720_s22, %s2128_s10  ;;  %p2133_p3 = scmp.lt.u32.totalorder %s2720_s22, %s2776_s7 }
 0x3ea   : > { %p2134_p7 = scmp.lt.u32.totalorder %s2132_s13, %s2128_s10  ;;  %p2136_p13 = scmp.lt.u32.totalorder %s2128_s10, %s2720_s22 }
 0x3eb   : > { %p2130_p1 = pnand %p2129_p9, %p2348_p10 }
 0x3ec   : > { %p2135_p4 = por %p2134_p7, %p2133_p3 }
 0x3ed   : > { %p2131_p2 = pneg %p2130_p1 }
 0x3ee   : > { %p2137_p6 = por %p2136_p13, %p2135_p4 }
 0x3f0   : > { %p2138_p8 = pnand %p2137_p6, %p2131_p2 }
 0x3f2   : > { %2141 = shalt.err (!%p2138_p8)
}
 0x3f3   : > { %1980 = dma.vmem_to_hbm [thread:$0]  (%p2348_p10), %s2722_s21, 16, %s2720_s22, %s1330_s15  }
 0x3f4 PF: > { %s1354_s19 = sand.u32 1, %s2180_s24   ;;  %p2796_p12 = scmp.ne.s32.totalorder %s2785_s12, 0 }
 0x3f5   : > { %p2797_p11 = scmp.ge.s32.totalorder %s2200_s29, 2  ;;  %s1355_s18 = scalar_lea.sflag [#allocation5], %s1354_s19 }
 0x3f7   : > { %p1991_p0 = pnand %p2797_p11, %p2796_p12 }
 0x3f9   : > { %2175 = dma.done.wait (!%p1991_p0), %s1355_s18, 16  }
 0x3fa   : > { %2177 = vsyncadd (!%p1991_p0), %s1355_s18, 4294967280  ;;  %s24_s29 = sadd.s32 1, %s2200_s29   ;;  %s2798_s24 = smov %s2184_s25 }
 0x3fb   : > { %p21_p5 = scmp.ge.s32.totalorder %s24_s29, 4   ;;  %s2799_s25 = smov %s2188_s26 }
 0x3fc   : > { %s2800_s26 = smov %s2357_s8  ;;  %s2801_s27 = smov %s2196_s28 }
 0x3fd   : > { %s2802_s28 = smov %s2804_s17  ;;  %23 = sbr.rel (!%p21_p5) target bundleno = 9 (0x9), region = 105 }
 0x404   :  { %1359 = vsyncpa [#allocation4], 1 }
 0x405   :  { %1361 = vsyncpa [#allocation4 + $0x1], 1 }
 0x406   :  { %1362 = vsyncpa [#allocation7], 1 }
 0x407   :  { %1363 = vsyncpa [#allocation5], 1 }
 0x408   :  { %1365 = vsyncpa [#allocation5 + $0x1], 1 }

</bundles_post_ra>
